<compile_context>
chip_gen: v7x
topology: tpu7x:2x2x1
jax: 0.10.0
libtpu: 0.0.40
codegen_flags: <defaults>
</compile_context>

<pallas_src>
import functools

import jax
import jax.numpy as jnp
from jax.experimental import pallas as pl
from jax.experimental.pallas import tpu as pltpu

GROWTH = 32
BLOCK_CONFIG = (6, 12, 24, 16)
NUM_INIT_FEATURES = 64
BN_SIZE = 4
NUM_CLASSES = 2


def _round_up(x, m):
    return (x + m - 1) // m * m


def _pad_rows(m):
    # Row (M) padding: one full tile when small, else 256-row tiles.
    if m <= 256:
        return _round_up(m, 16)
    return _round_up(m, 256)


# ------------- fused GEMM (+BN/ReLU prologue/epilogue) Pallas kernel --------
# Single K step (tk == Kp): at DenseNet-121 sizes the whole-K working set
# (A tile <= 256x1152 bf16, B tile <= 1152x256 bf16, double buffered) is
# < 3 MiB, well inside VMEM on v5e/v6e/v7x, so there is no accumulator
# scratch and no init/finalize phases — one grid step per (M, N) tile.

def _mm_kernel(*refs, use_pre, use_post, post_relu):
    refs = list(refs)
    a_ref = refs.pop(0)
    b_ref = refs.pop(0)
    ps_ref = refs.pop(0) if use_pre else None
    pt_ref = refs.pop(0) if use_pre else None
    qs_ref = refs.pop(0) if use_post else None
    qt_ref = refs.pop(0) if use_post else None
    o_ref = refs.pop(0)

    a = a_ref[...]
    if use_pre:
        # per-input-channel BatchNorm + ReLU prologue (exact for 1x1 convs)
        a = jnp.maximum(a.astype(jnp.float32) * ps_ref[...] + pt_ref[...], 0.0)
        a = a.astype(jnp.bfloat16)
    r = jnp.dot(a, b_ref[...], preferred_element_type=jnp.float32)
    if use_post:
        # per-output-channel BatchNorm(+ReLU) or bias epilogue
        r = r * qs_ref[...] + qt_ref[...]
        if post_relu:
            r = jnp.maximum(r, 0.0)
    o_ref[...] = r.astype(o_ref.dtype)


@functools.partial(jax.jit,
                   static_argnames=("use_pre", "use_post", "post_relu",
                                    "out_dtype"))
def _mm_call(a, b, *vecs, use_pre, use_post, post_relu, out_dtype):
    mp, kp = a.shape
    _, np_ = b.shape
    tm = mp if mp <= 256 else 256
    if np_ <= 256:
        tn = np_
    else:
        tn = 256 if np_ % 256 == 0 else 128
    grid = (mp // tm, np_ // tn)

    in_specs = [pl.BlockSpec((tm, kp), lambda i, j: (i, 0)),
                pl.BlockSpec((kp, tn), lambda i, j: (0, j))]
    if use_pre:
        in_specs += [pl.BlockSpec((1, kp), lambda i, j: (0, 0)),
                     pl.BlockSpec((1, kp), lambda i, j: (0, 0))]
    if use_post:
        in_specs += [pl.BlockSpec((1, tn), lambda i, j: (0, j)),
                     pl.BlockSpec((1, tn), lambda i, j: (0, j))]

    kernel = functools.partial(_mm_kernel, use_pre=use_pre, use_post=use_post,
                               post_relu=post_relu)
    return pl.pallas_call(
        kernel,
        out_shape=jax.ShapeDtypeStruct((mp, np_), out_dtype),
        grid_spec=pltpu.PrefetchScalarGridSpec(
            num_scalar_prefetch=0,
            grid=grid,
            in_specs=in_specs,
            out_specs=pl.BlockSpec((tm, tn), lambda i, j: (i, j))),
        compiler_params=pltpu.CompilerParams(
            dimension_semantics=("parallel", "parallel")),
    )(a, b, *vecs)


# ----------------------- conv glue (XLA side, bf16) ------------------------

def _im2col(x, kh, kw, stride, pad):
    n, h, w, c = x.shape
    if pad > 0:
        x = jnp.pad(x, ((0, 0), (pad, pad), (pad, pad), (0, 0)))
    hp, wp = h + 2 * pad, w + 2 * pad
    oh = (hp - kh) // stride + 1
    ow = (wp - kw) // stride + 1
    cols = []
    for i in range(kh):
        for j in range(kw):
            cols.append(x[:, i:i + stride * (oh - 1) + 1:stride,
                          j:j + stride * (ow - 1) + 1:stride, :])
    patches = jnp.concatenate(cols, axis=-1)          # (kh, kw, cin) ordering
    return patches.reshape(n * oh * ow, kh * kw * c), (n, oh, ow)


def conv2d(x, w2d, cout, kh, kw, stride=1, pad=0,
           pre=None, post=None, post_relu=False):
    # w2d: pre-padded [Kp, Np] bf16 weight, K-rows ordered (kh, kw, cin).
    n, h, w, cin = x.shape
    kdim = kh * kw * cin
    kp, np_ = w2d.shape
    if kh == 1 and kw == 1 and stride == 1 and pad == 0:
        a = x.reshape(n * h * w, cin)
        oh, ow = h, w
    else:
        # TODO(synk): replace im2col with an in-kernel shifted-window
        # K-accumulation (tap offsets via the index_map) to avoid
        # materializing the kh*kw-times-inflated patch tensor in HBM.
        a, (n, oh, ow) = _im2col(x, kh, kw, stride, pad)
    m = a.shape[0]
    mp = _pad_rows(m)
    if mp != m or kp != kdim:
        a = jnp.pad(a, ((0, mp - m), (0, kp - kdim)))
    vecs = []
    if pre is not None:
        vecs += list(pre)
    if post is not None:
        vecs += list(post)
    y = _mm_call(a, w2d, *vecs,
                 use_pre=pre is not None, use_post=post is not None,
                 post_relu=post_relu, out_dtype=jnp.bfloat16)
    if mp != m or np_ != cout:
        y = y[:m, :cout]
    return y.reshape(n, oh, ow, cout)


# ------------------------------ pooling ------------------------------------

def _max_reduce_kernel(x_ref, o_ref):
    kk = x_ref.shape[1]
    r = x_ref[:, 0, :]
    for k in range(1, kk):
        r = jnp.maximum(r, x_ref[:, k, :])
    o_ref[...] = r


def _mean_reduce_kernel(x_ref, o_ref):
    kk = x_ref.shape[1]
    r = x_ref[:, 0, :].astype(jnp.float32)
    for k in range(1, kk):
        r = r + x_ref[:, k, :].astype(jnp.float32)
    o_ref[...] = (r * (1.0 / kk)).astype(o_ref.dtype)


def _make_reduce(kernel):
    @jax.jit
    def call(patches):
        m, kk, c = patches.shape
        tm = m if m <= 512 else 512
        mp = _round_up(m, tm)
        if mp != m:
            patches = jnp.pad(patches, ((0, mp - m), (0, 0), (0, 0)))
        out = pl.pallas_call(
            kernel,
            out_shape=jax.ShapeDtypeStruct((mp, c), patches.dtype),
            grid=(mp // tm,),
            in_specs=[pl.BlockSpec((tm, kk, c), lambda i: (i, 0, 0))],
            out_specs=pl.BlockSpec((tm, c), lambda i: (i, 0)),
            compiler_params=pltpu.CompilerParams(
                dimension_semantics=("parallel",)),
        )(patches)
        return out[:m] if mp != m else out
    return call


_reduce_max = _make_reduce(_max_reduce_kernel)
_reduce_mean = _make_reduce(_mean_reduce_kernel)


def _pool_patches(x, k, stride, pad, pad_value):
    # TODO(synk): fuse pooling into the preceding GEMM epilogue / use strided
    # in-kernel reads instead of materializing k*k patch copies in HBM.
    n, h, w, c = x.shape
    if pad > 0:
        x = jnp.pad(x, ((0, 0), (pad, pad), (pad, pad), (0, 0)),
                    constant_values=pad_value)
    hp, wp = h + 2 * pad, w + 2 * pad
    oh = (hp - k) // stride + 1
    ow = (wp - k) // stride + 1
    cols = []
    for i in range(k):
        for j in range(k):
            cols.append(x[:, i:i + stride * (oh - 1) + 1:stride,
                          j:j + stride * (ow - 1) + 1:stride, :][:, :, :, None, :])
    patches = jnp.concatenate(cols, axis=3)
    return patches.reshape(n * oh * ow, k * k, c), (n, oh, ow)


def max_pool(x, k, stride, pad):
    c = x.shape[-1]
    patches, (n, oh, ow) = _pool_patches(x, k, stride, pad, float("-inf"))
    return _reduce_max(patches).reshape(n, oh, ow, c)


def avg_pool2x2(x):
    c = x.shape[-1]
    patches, (n, oh, ow) = _pool_patches(x, 2, 2, 0, 0.0)
    return _reduce_mean(patches).reshape(n, oh, ow, c)


def _global_pool_kernel(x_ref, s_ref, t_ref, o_ref):
    x = x_ref[...].astype(jnp.float32)
    x = jnp.maximum(x * s_ref[...] + t_ref[...], 0.0)     # norm5 + F.relu
    o_ref[...] = jnp.mean(x, axis=1, keepdims=True).astype(o_ref.dtype)


@jax.jit
def global_avg_pool_bn_relu(x, s, t):
    n, h, w, c = x.shape
    hw = h * w
    x3 = x.reshape(n, hw, c)
    out = pl.pallas_call(
        _global_pool_kernel,
        out_shape=jax.ShapeDtypeStruct((n, 1, c), jnp.bfloat16),
        grid=(n,),
        in_specs=[pl.BlockSpec((1, hw, c), lambda b: (b, 0, 0)),
                  pl.BlockSpec((1, 1, c), lambda b: (0, 0, 0)),
                  pl.BlockSpec((1, 1, c), lambda b: (0, 0, 0))],
        out_specs=pl.BlockSpec((1, 1, c), lambda b: (b, 0, 0)),
        compiler_params=pltpu.CompilerParams(
            dimension_semantics=("parallel",)),
    )(x3, s, t)
    return out.reshape(n, c)


def classifier(feat, w2d, post_s, post_t, num_classes):
    nb, k = feat.shape                      # k == 1024 (already 128-aligned)
    mp = _pad_rows(nb)
    a = jnp.pad(feat, ((0, mp - nb), (0, 0))) if mp != nb else feat
    logits = _mm_call(a, w2d, post_s, post_t,
                      use_pre=False, use_post=True, post_relu=False,
                      out_dtype=jnp.float32)
    return logits[:nb, :num_classes]


# ------------------------------ parameters ---------------------------------

def build_params(seed=0):
    base = jax.random.PRNGKey(seed)
    cnt = [0]

    def nk():
        cnt[0] += 1
        return jax.random.fold_in(base, cnt[0])

    def conv_w2d(kh, kw, cin, cout):
        fan_in = kh * kw * cin
        w = (jax.random.normal(nk(), (kh, kw, cin, cout), jnp.float32)
             * jnp.sqrt(2.0 / fan_in))
        kdim, n = kh * kw * cin, cout
        kp, np_ = _round_up(kdim, 128), _round_up(n, 128)
        w2 = jnp.pad(w.reshape(kdim, n), ((0, kp - kdim), (0, np_ - n)))
        return w2.astype(jnp.bfloat16)

    def bn_vec(c, padto):
        # inference BatchNorm folded to y = x * scale + shift
        gamma = jax.random.uniform(nk(), (c,), minval=0.8, maxval=1.2)
        beta = 0.05 * jax.random.normal(nk(), (c,))
        mean = 0.05 * jax.random.normal(nk(), (c,))
        var = jax.random.uniform(nk(), (c,), minval=0.8, maxval=1.2)
        scale = (gamma / jnp.sqrt(var + 1e-5)).astype(jnp.float32)
        shift = (beta - mean * scale).astype(jnp.float32)
        s = jnp.pad(scale, (0, padto - c)).reshape(1, padto)
        t = jnp.pad(shift, (0, padto - c)).reshape(1, padto)
        return s, t

    p = {}
    p['conv0_w'] = conv_w2d(7, 7, 3, NUM_INIT_FEATURES)
    p['norm0_s'], p['norm0_t'] = bn_vec(NUM_INIT_FEATURES,
                                        _round_up(NUM_INIT_FEATURES, 128))
    ch = NUM_INIT_FEATURES
    blocks = []
    for bi, num_layers in enumerate(BLOCK_CONFIG):
        layers = []
        for _ in range(num_layers):
            lp = {}
            lp['pre1_s'], lp['pre1_t'] = bn_vec(ch, _round_up(ch, 128))   # norm1
            lp['w1'] = conv_w2d(1, 1, ch, BN_SIZE * GROWTH)
            lp['post1_s'], lp['post1_t'] = bn_vec(                        # norm2
                BN_SIZE * GROWTH, _round_up(BN_SIZE * GROWTH, 128))
            lp['w2'] = conv_w2d(3, 3, BN_SIZE * GROWTH, GROWTH)
            layers.append(lp)
            ch += GROWTH
        blk = {'layers': layers}
        if bi != len(BLOCK_CONFIG) - 1:                                   # transition
            blk['trans_pre_s'], blk['trans_pre_t'] = bn_vec(ch, _round_up(ch, 128))
            blk['trans_w'] = conv_w2d(1, 1, ch, ch // 2)
            ch //= 2
        blocks.append(blk)
    p['blocks'] = blocks
    s5, t5 = bn_vec(ch, ch)                       # ch == 1024
    p['norm5_s'] = s5.reshape(1, 1, ch)
    p['norm5_t'] = t5.reshape(1, 1, ch)
    npad = _round_up(NUM_CLASSES, 128)
    fcw = (jax.random.normal(nk(), (ch, NUM_CLASSES), jnp.float32)
           * jnp.sqrt(1.0 / ch))
    fcb = 0.01 * jax.random.normal(nk(), (NUM_CLASSES,)).astype(jnp.float32)
    p['fc_w'] = jnp.pad(fcw, ((0, 0), (0, npad - NUM_CLASSES))).astype(jnp.bfloat16)
    p['fc_post_s'] = jnp.pad(jnp.ones((NUM_CLASSES,), jnp.float32),
                             (0, npad - NUM_CLASSES)).reshape(1, npad)
    # real classifier bias, folded into the GEMM epilogue
    p['fc_post_t'] = jnp.pad(fcb, (0, npad - NUM_CLASSES)).reshape(1, npad)
    return p


# -------------------------------- forward ----------------------------------

def densenet_forward(params, x_nchw):
    x = jnp.transpose(x_nchw, (0, 2, 3, 1)).astype(jnp.bfloat16)  # NCHW -> NHWC
    # conv0 7x7/2 pad 3, norm0+relu0 fused into the GEMM epilogue
    x = conv2d(x, params['conv0_w'], NUM_INIT_FEATURES, 7, 7, 2, 3,
               post=(params['norm0_s'], params['norm0_t']), post_relu=True)
    x = max_pool(x, 3, 2, 1)                                      # pool0
    ch = NUM_INIT_FEATURES
    for bi, num_layers in enumerate(BLOCK_CONFIG):
        blk = params['blocks'][bi]
        for li in range(num_layers):                              # _DenseLayer
            lp = blk['layers'][li]
            # 1x1 bottleneck: norm1+relu1 prologue, norm2+relu2 epilogue
            y = conv2d(x, lp['w1'], BN_SIZE * GROWTH, 1, 1, 1, 0,
                       pre=(lp['pre1_s'], lp['pre1_t']),
                       post=(lp['post1_s'], lp['post1_t']), post_relu=True)
            # 3x3 growth conv (input already normalized + activated)
            y = conv2d(y, lp['w2'], GROWTH, 3, 3, 1, 1)
            # TODO(synk): write y in place into a preallocated block buffer
            # (aliased pallas output at a channel offset) to remove the O(L^2)
            # HBM traffic of this growing concat.
            x = jnp.concatenate([x, y], axis=-1)
            ch += GROWTH
        if bi != len(BLOCK_CONFIG) - 1:                           # _Transition
            x = conv2d(x, blk['trans_w'], ch // 2, 1, 1, 1, 0,
                       pre=(blk['trans_pre_s'], blk['trans_pre_t']))
            x = avg_pool2x2(x)
            ch //= 2
    # norm5 + F.relu fused into the global average pool; then classifier GEMM
    feat = global_avg_pool_bn_relu(x, params['norm5_s'], params['norm5_t'])
    return classifier(feat, params['fc_w'], params['fc_post_s'],
                      params['fc_post_t'], NUM_CLASSES)


if __name__ == "__main__":
    params = build_params(seed=0)
    x = jax.random.normal(jax.random.PRNGKey(0), (2, 3, 32, 32), jnp.float32)
    fwd = jax.jit(densenet_forward)          # compile the whole forward once
    logits = fwd(params, x)
    logits = jax.block_until_ready(logits)
    assert logits.shape == (2, NUM_CLASSES), logits.shape
    print("KERNEL_OK")
</pallas_src>

<mosaic_0001>
module attributes {stable_mosaic.version = 11 : i64} {
  func.func @_mm_kernel(%arg0: i32, %arg1: i32, %arg2: memref<256x256xbf16, #tpu.memory_space<vmem>>, %arg3: memref<256x128xbf16, #tpu.memory_space<vmem>>, %arg4: memref<1x128xf32, #tpu.memory_space<vmem>>, %arg5: memref<1x128xf32, #tpu.memory_space<vmem>>, %arg6: memref<256x128xbf16, #tpu.memory_space<vmem>>) attributes {dimension_semantics = [#tpu.dimension_semantics<parallel>, #tpu.dimension_semantics<parallel>], iteration_bounds = array<i64: 2, 1>, scalar_prefetch = 0 : i64, scratch_operands = 0 : i64, tpu.core_type = #tpu.core_type<tc>, window_params = [{transform_indices = @transform_0, window_bounds = array<i64: 256, 256>}, {transform_indices = @transform_1, window_bounds = array<i64: 256, 128>}, {transform_indices = @transform_2, window_bounds = array<i64: 1, 128>}, {transform_indices = @transform_3, window_bounds = array<i64: 1, 128>}, {transform_indices = @transform_4, window_bounds = array<i64: 256, 128>}]} {
    %c0 = arith.constant 0 : index
    %c0_0 = arith.constant 0 : index
    %0 = vector.load %arg2[%c0, %c0_0] : memref<256x256xbf16, #tpu.memory_space<vmem>>, vector<256x256xbf16>
    %c0_1 = arith.constant 0 : index
    %c0_2 = arith.constant 0 : index
    %1 = vector.load %arg3[%c0_1, %c0_2] : memref<256x128xbf16, #tpu.memory_space<vmem>>, vector<256x128xbf16>
    %cst = arith.constant dense<0.000000e+00> : vector<256x128xf32>
    %2 = tpu.matmul %0, %1, %cst {dimension_numbers = #tpu.dot_dimension_numbers<[1], [0], [0], [1], [0, 0, 1, 1], [], []>} : vector<256x256xbf16>, vector<256x128xbf16>, vector<256x128xf32> -> vector<256x128xf32>
    %c0_3 = arith.constant 0 : index
    %c0_4 = arith.constant 0 : index
    %3 = vector.load %arg4[%c0_3, %c0_4] : memref<1x128xf32, #tpu.memory_space<vmem>>, vector<1x128xf32>
    %4 = vector.broadcast %3 : vector<1x128xf32> to vector<256x128xf32>
    %5 = arith.mulf %2, %4 : vector<256x128xf32>
    %c0_5 = arith.constant 0 : index
    %c0_6 = arith.constant 0 : index
    %6 = vector.load %arg5[%c0_5, %c0_6] : memref<1x128xf32, #tpu.memory_space<vmem>>, vector<1x128xf32>
    %7 = vector.broadcast %6 : vector<1x128xf32> to vector<256x128xf32>
    %8 = arith.addf %5, %7 : vector<256x128xf32>
    %cst_7 = arith.constant 0.000000e+00 : f32
    %9 = vector.broadcast %cst_7 : f32 to vector<256x128xf32>
    %10 = arith.maximumf %8, %9 : vector<256x128xf32>
    %11 = arith.truncf %10 : vector<256x128xf32> to vector<256x128xbf16>
    %c0_8 = arith.constant 0 : index
    %c0_9 = arith.constant 0 : index
    %12 = vector.load %arg6[%c0_8, %c0_9] : memref<256x128xbf16, #tpu.memory_space<vmem>>, vector<256x128xbf16>
    tpu.vector_store %arg6[%c0_8, %c0_9], %11 {strides = array<i32>} : memref<256x128xbf16, #tpu.memory_space<vmem>>, vector<256x128xbf16>,
    return
  }
  func.func @transform_0(%arg0: i32, %arg1: i32) -> (i32, i32) {
    %c0_i32 = arith.constant 0 : i32
    %c0_i32_0 = arith.constant 0 : i32
    return %arg0, %c0_i32 : i32, i32
  }
  func.func @transform_1(%arg0: i32, %arg1: i32) -> (i32, i32) {
    %c0_i32 = arith.constant 0 : i32
    %c0_i32_0 = arith.constant 0 : i32
    return %c0_i32, %arg1 : i32, i32
  }
  func.func @transform_2(%arg0: i32, %arg1: i32) -> (i32, i32) {
    %c0_i32 = arith.constant 0 : i32
    %c0_i32_0 = arith.constant 0 : i32
    return %c0_i32, %arg1 : i32, i32
  }
  func.func @transform_3(%arg0: i32, %arg1: i32) -> (i32, i32) {
    %c0_i32 = arith.constant 0 : i32
    %c0_i32_0 = arith.constant 0 : i32
    return %c0_i32, %arg1 : i32, i32
  }
  func.func @transform_4(%arg0: i32, %arg1: i32) -> (i32, i32) {
    %c0_i32 = arith.constant 0 : i32
    return %arg0, %arg1 : i32, i32
  }
}

</mosaic_0001>

<bundles_post_ra>
// kernel: _mm_call.1
= control target key start
LH: loop header
LB: loop body
LE: loop exit
PB: predicated region body
PF: predicated region fallthrough
CT: control target
= control target key end

     0   :  { %9 = vsyncpa [#allocation3], 0  ;;  %s2199_s0 = inlined_call_operand.hbm [shape: bf16[512,256], index: 0, kind: input, shape index: {}]   ;;  %s2200_s1 = inlined_call_operand.hbm [shape: bf16[256,128], index: 1, kind: input, shape index: {}]   ;;  %s2201_s2 = inlined_call_operand.vmem [shape: f32[1,128], index: 2, kind: input, shape index: {}]   ;;  %s2202_s3 = inlined_call_operand.vmem [shape: f32[1,128], index: 3, kind: input, shape index: {}]   ;;  %s2203_s4 = inlined_call_operand.hbm [shape: bf16[512,128], index: 4, kind: output, shape index: {}]  }
   0x1   :  { %11 = vsyncpa [#allocation3 + $0x1], 0 }
   0x2   :  { %12 = vsyncpa [#allocation6], 0 }
   0x3   :  { %13 = vsyncpa [#allocation4], 0 }
   0x4   :  { %15 = vsyncpa [#allocation4 + $0x1], 0  ;;  %s1852_s15 = smov 0   ;;  %s1854_s16 = smov 0  }
   0x5   :  { %s1856_s17 = smov 0   ;;  %s1858_s18 = smov 0  }
   0x6   :  { %s1860_s19 = smov 0   ;;  %s1862_s20 = smov 0  }
   0x7 LB: > { %s1169_s21 = sadd.s32 4294967295, %s1816_s20   ;;  %s1170_s22 = sadd.s32 4294967294, %s1816_s20   ;;  %s1816_s20 = sphi %s1862_s20, %s21_s20   ;;  %s1812_s19 = sphi %s1860_s19, %s2227_s19   ;;  %s1808_s18 = sphi %s1858_s18, %s2226_s18   ;;  %s1804_s17 = sphi %s1856_s17, %s2225_s17   ;;  %s1800_s16 = sphi %s1854_s16, %s2224_s16   ;;  %s1796_s15 = sphi %s1852_s15, %s2223_s15  }
   0x8   : > { %p53_p0 = scmp.ne.s32.totalorder %s1800_s16, %s1796_s15  ;;  %p1886_p1 = scmp.eq.s32.totalorder %s1169_s21, 0 }
   0x9   : > { %p1890_p2 = scmp.eq.s32.totalorder %s1169_s21, 1  ;;  %p163_p3 = scmp.eq.s32.totalorder %s1170_s22, 1 }
   0xa   : > { %s2208_s23 = scalar_select %p1886_p1, 1, 0 }
   0xb   : > { %s2209_s24 = scalar_select %p1890_p2, 1, 0 }
   0xc   : > { %p1896_p4 = por %p1886_p1, %p53_p0  ;;  %p1171_p5 = scmp.ge.s32.totalorder %s1816_s20, 1 }
   0xd   : > { %p1901_p6 = por %p163_p3, %p53_p0  ;;  %p170_p7 = scmp.lt.s32.totalorder %s1816_s20, 3 }
   0xe   : > { %s2210_s25 = scalar_select %p1896_p4, 1, 0 }
   0xf   : > { %s2211_s26 = scalar_select %p1901_p6, 1, 0 }
  0x10   : > { %p1906_p8 = pnand %p1171_p5, %p170_p7  ;;  %s1818_s28 = smov [#allocation5]  }
  0x11   : > { %s184_s29 = sshll.u32 %s1818_s28, 4  ;;  %s33_s5 = sadd.s32 1, %s1812_s19  ;;  %s185_s29 = int_to_ptr.vmem [resolvable:$true] %s184_s29 }
  0x12   : > { %s2212_s27 = scalar_select %p1906_p8, 1, 0 }
  0x13   : > { %p1537_p9 = pneg %p1906_p8  ;;  %s1672_s8 = scalar_lea.hbm %s2200_s1, 2048 }
  0x14   : > { %p1673_p12 = scmp.ne.s32.totalorder %s2200_s1, %s1672_s8  ;;  %p1679_p5 = scmp.lt.u32.totalorder %s1672_s8, %s2200_s1 }
  0x15   : > { %p1915_p11 = pnand %p1537_p9, %p1886_p1 }
  0x17   : > { %p1674_p13 = pneg %p1915_p11 }
  0x19   : > { %p1675_p0 = pnand %p1674_p13, %p1673_p12 }
  0x1b   : > { %p1676_p3 = pneg %p1675_p0 }
  0x1d   : > { %p1681_p7 = pnand %p1679_p5, %p1676_p3 }
  0x1f   : > { %1684 = shalt.err (!%p1681_p7)
}
  0x20   : > { %s1685_s13 = scalar_lea.vmem %s185_s29, 2048  ;;  %p1693_p1 = scmp.lt.s32.totalorder %s185_s29, %s185_s29 }
  0x21   : > { %p1686_p9 = scmp.ne.s32.totalorder %s185_s29, %s1685_s13  ;;  %p1694_p4 = scmp.lt.s32.totalorder %s1685_s13, %s1685_s13 }
  0x23   : > { %p1688_p10 = pnand %p1686_p9, %p1674_p13  ;;  %p1695_p8 = por %p1694_p4, %p1693_p1 }
  0x25   : > { %p1689_p6 = pneg %p1688_p10 }
  0x27   : > { %p1696_p2 = pnand %p1695_p8, %p1689_p6 }
  0x29   : > { %1699 = shalt.err (!%p1696_p2)
}
  0x2a   : > { %s1819_s14 = smov 64   ;;  %s1820_s21 = smov 4  }
  0x2b   : > { %1540 = dma.hbm_to_vmem [thread:$0]  (!%p1915_p11), %s2200_s1, 2048, %s185_s29, [#allocation6], %s1819_s14, %s1819_s14, %s1820_s21  }
  0x2c   : > { %p35_p1 = scmp.ge.s32.totalorder %s33_s5, 2  ;;  %s40_s6 = sadd.s32 1, %s1804_s17 }
  0x2d   : > { %p47_p2 = scmp.ne.s32.totalorder %s1804_s17, %s1800_s16  ;;  %p48_p4 = scmp.eq.s32.totalorder %s1816_s20, 0 }
  0x2e   : > { %s2229_s5 = smov (%p35_p1, %s33_s5), 0  ;;  %p2215_p8 = scmp.ne.s32.totalorder %s2209_s24, 0 }
  0x2f   : > { %p1942_p6 = por %p48_p4, %p47_p2  ;;  %s37_s30 = ssub.s32 %s1812_s19, %s2229_s5 }
  0x30   : > { %p1948_p10 = por %p2215_p8, %p47_p2  ;;  %p1550_p12 = scmp.lt.s32.totalorder %s1816_s20, 2 }
  0x31   : > { %p38_p11 = scmp.eq.s32.totalorder %s37_s30, 0  ;;  %s210_s29 = sand.u32 1, %s1804_s17  }
  0x32   : > { %s1176_s9 = sshll.u32 %s210_s29, 8  ;;  %s1272_s11 = sshll.u32 %s1812_s19, 12 }
  0x33   : > { %s1957_s10 = scalar_select %p38_p11, %s1804_s17, %s40_s6  }
  0x34   : > { %s1963_s14 = scalar_lea.hbm %s2199_s0, %s1272_s11  ;;  %s214_s24 = scalar_lea.vmem [#allocation2], %s1176_s9 }
  0x35   : > { %s222_s21 = sshll.u32 %s214_s24, 4  ;;  %p1969_p13 = pnand %p1550_p12, %p1942_p6  ;;  %s1965_s21 = int_to_ptr.vmem [resolvable:$true] %s222_s21 }
  0x36   : > { %s1973_s28 = scalar_lea.sflag [#allocation3], %s210_s29  ;;  %s1700_s6 = scalar_lea.hbm %s1963_s14, 4096 }
  0x37   : > { %p1701_p0 = scmp.ne.s32.totalorder %s1963_s14, %s1700_s6  ;;  %p1702_p3 = pneg %p1969_p13 }
  0x38   : > { %s1705_s7 = scalar_lea.hbm %s2199_s0, 8192  ;;  %p1706_p9 = scmp.lt.u32.totalorder %s1963_s14, %s2199_s0 }
  0x39   : > { %p1703_p5 = pnand %p1702_p3, %p1701_p0  ;;  %p1707_p1 = scmp.lt.u32.totalorder %s1705_s7, %s1700_s6 }
  0x3a   : > { %p1709_p4 = scmp.lt.u32.totalorder %s1700_s6, %s1963_s14 }
  0x3b   : > { %p1704_p7 = pneg %p1703_p5  ;;  %p1708_p2 = por %p1707_p1, %p1706_p9 }
  0x3d   : > { %p1710_p6 = por %p1709_p4, %p1708_p2 }
  0x3f   : > { %p1711_p8 = pnand %p1710_p6, %p1704_p7 }
  0x41   : > { %1714 = shalt.err (!%p1711_p8)
}
  0x42   : > { %s1715_s29 = scalar_lea.vmem %s1965_s21, 4096  ;;  %s1821_s13 = smov [#allocation2]  }
  0x43   : > { %p1716_p12 = scmp.ne.s32.totalorder %s1965_s21, %s1715_s29  ;;  %s1720_s24 = sshll.u32 %s1821_s13, 4  ;;  %s1721_s24 = int_to_ptr.vmem [resolvable:$false] %s1720_s24 }
  0x44   : > { %s1722_s30 = scalar_lea.vmem %s1721_s24, 8192  ;;  %p1723_p5 = scmp.lt.s32.totalorder %s1965_s21, %s1721_s24 }
  0x45   : > { %p1718_p11 = pnand %p1716_p12, %p1702_p3  ;;  %p1724_p9 = scmp.lt.s32.totalorder %s1722_s30, %s1715_s29 }
  0x47   : > { %p1719_p0 = pneg %p1718_p11  ;;  %p1725_p1 = por %p1724_p9, %p1723_p5 }
  0x49   : > { %p1726_p2 = pnand %p1725_p1, %p1719_p0 }
  0x4b   : > { %1729 = shalt.err (!%p1726_p2)
}
  0x4c   : > { %s1822_s6 = smov 128   ;;  %s1823_s9 = smov 8  }
  0x4d   : > { %1544 = dma.hbm_to_vmem [thread:$0]  (!%p1969_p13), %s1963_s14, 4096, %s1965_s21, %s1973_s28, %s1822_s6, %s1822_s6, %s1823_s9  }
  0x4e   : > { %p2218_p3 = scmp.ne.s32.totalorder %s2212_s27, 0 }
  0x4f   : > { %s2004_s7 = sand.u32 (!%p2218_p3), 1, %s1800_s16   ;;  %p2219_p7 = scmp.ne.s32.totalorder (!%p2218_p3), %s2210_s25, 0 }
  0x50   : > { %234 = sbr.rel (%p2218_p3) target bundleno = 421 (0x1a5), region = 36  ;;  %s1181_s11 = sshll.u32 (!%p2218_p3), %s2004_s7, 8 }
  0x51   : > { %s237_s12 = scalar_lea.sflag (!%p2218_p3), [#allocation3], %s2004_s7  ;;  %s2008_s29 = scalar_lea.vmem (!%p2218_p3), [#allocation2], %s1181_s11 }
  0x57   : > { %1783 = dma.done.wait (%p2219_p7), %s237_s12, 4096  }
  0x58   : > { %1785 = vsyncadd (%p2219_p7), %s237_s12, 4294963200  ;;  %p2220_p13 = scmp.ne.s32.totalorder %s2208_s23, 0 }
  0x5a   : > { %1787 = dma.done.wait (%p2220_p13), [#allocation6], 2048  }
  0x5b   : > { %1789 = vsyncadd (%p2220_p13), [#allocation6], 4294965248  ;;  %v1608_v0 = vld [vmem:[#allocation5 + $0x40] sm:$0xff]   ;;  %v1610_v2 = vld [vmem:[#allocation5 + $0x48] sm:$0xff]   ;;  %s1183_s21 = sshll.u32 %s2004_s7, 7  ;;  %s1305_s28 = sshll.u32 %s1808_s18, 11 }
  0x5c   : > { %v1609_v1 = vld [vmem:[#allocation5] sm:$0xff]   ;;  %1401 = vmatprep.subr.bf16.mxu0 %v1608_v0  ;;  %1513 = vmatprep.subr.bf16.mxu1 %v1608_v0  ;;  %v1611_v3 = vld [vmem:[#allocation5 + $0x8] sm:$0xff]   ;;  %v1612_v4 = vld [vmem:[#allocation5 + $0x50] sm:$0xff]   ;;  %s2071_s22 = scalar_lea.vmem [#allocation7], %s1183_s21  ;;  %s2146_s6 = scalar_lea.hbm %s2203_s4, %s1305_s28 }
  0x5d   : > { %1402 = vmatpush3.bf16.msra.mxu0 %v1609_v1  ;;  %1521 = vmatpush3.bf16.msra.mxu1 %v1609_v1  ;;  %v1613_v5 = vld [vmem:[#allocation5 + $0x10] sm:$0xff]   ;;  %v1614_v6 = vld [vmem:[#allocation5 + $0x58] sm:$0xff]   ;;  %v1616_v8 = vld [vmem:[#allocation5 + $0x60] sm:$0xff]   ;;  %s1050_s13 = sshll.u32 %s2071_s22, 4  ;;  %s1036_s18 = scalar_lea.sflag [#allocation4], %s2004_s7  ;;  %s2148_s13 = int_to_ptr.vmem [resolvable:$true] %s1050_s13 }
  0x5e   : > { %1403 = vmatprep.subr.bf16.mxu0 %v1610_v2  ;;  %1514 = vmatprep.subr.bf16.mxu1 %v1610_v2  ;;  %v1615_v7 = vld [vmem:[#allocation5 + $0x18] sm:$0xff]   ;;  %v1617_v9 = vld [vmem:[#allocation5 + $0x20] sm:$0xff]   ;;  %v1618_v10 = vld [vmem:[#allocation5 + $0x68] sm:$0xff]   ;;  %s1730_s9 = scalar_lea.vmem %s2148_s13, 2048  ;;  %s1824_s11 = smov [#allocation7]  }
  0x5f   : > { %v1626_v11 = vld [vmem:[%s2008_s29 + $0x4] ss:$8 sps:$4 sm:$0xff]   ;;  %v1620_v14 = vld [vmem:[#allocation5 + $0x70] sm:$0xff]   ;;  %v1622_v16 = vld [vmem:[#allocation5 + $0x78] sm:$0xff]   ;;  %p1731_p4 = scmp.ne.s32.totalorder %s2148_s13, %s1730_s9  ;;  %s1734_s12 = sshll.u32 %s1824_s11, 4  ;;  %s1735_s12 = int_to_ptr.vmem [resolvable:$false] %s1734_s12 }
  0x60   : > { %v1629_v12 = vld [vmem:[%s2008_s29 + $0x84] ss:$8 sps:$4 sm:$0xff]   ;;  %636 = vmatprep.mubr.bf16.mxu0 %v1626_v11  ;;  %v1621_v15 = vld [vmem:[#allocation5 + $0x30] sm:$0xff]   ;;  %v1623_v17 = vld [vmem:[#allocation5 + $0x38] sm:$0xff]   ;;  %p1737_p12 = scmp.lt.s32.totalorder %s2148_s13, %s1735_s12 }
  0x61   : > { %1404 = vmatpush3.bf16.msra.mxu0 %v1611_v3  ;;  %1522 = vmatpush3.bf16.msra.mxu1 %v1611_v3  ;;  %v1619_v13 = vld [vmem:[#allocation5 + $0x28] sm:$0xff]   ;;  %v1630_v20 = vld [vmem:[%s2008_s29 + $0x14] ss:$8 sps:$4 sm:$0xff]   ;;  %v1634_v22 = vld [vmem:[%s2008_s29 + $0x10] ss:$8 sps:$4 sm:$0xff]   ;;  %p1732_p6 = pnand %p1731_p4, %p1948_p10 }
  0x62   : > { %1405 = vmatprep.subr.bf16.mxu0 %v1612_v4  ;;  %1515 = vmatprep.subr.bf16.mxu1 %v1612_v4  ;;  %v1624_v18 = vld [vmem:[%s2008_s29] ss:$8 sps:$4 sm:$0xff]   ;;  %v1632_v21 = vld [vmem:[%s2008_s29 + $0x94] ss:$8 sps:$4 sm:$0xff]   ;;  %v1635_v23 = vld [vmem:[%s2008_s29 + $0x90] ss:$8 sps:$4 sm:$0xff]  }
  0x63   : > { %700 = vmatprep.mubr.bf16.mxu1 %v1629_v12  ;;  %v1627_v19 = vld [vmem:[%s2008_s29 + $0x80] ss:$8 sps:$4 sm:$0xff]   ;;  %v1636_v24 = vld [vmem:[%s2008_s29 + $0x24] ss:$8 sps:$4 sm:$0xff]   ;;  %v1642_v28 = vld [vmem:[%s2008_s29 + $0x34] ss:$8 sps:$4 sm:$0xff]   ;;  %p1733_p8 = pneg %p1732_p6 }
  0x64   : > { %v1638_v25 = vld [vmem:[%s2008_s29 + $0xa4] ss:$8 sps:$4 sm:$0xff]   ;;  %v1640_v26 = vld [vmem:[%s2008_s29 + $0x20] ss:$8 sps:$4 sm:$0xff]   ;;  %v1644_v29 = vld [vmem:[%s2008_s29 + $0xb4] ss:$8 sps:$4 sm:$0xff]  }
  0x65   : > { %1406 = vmatpush3.bf16.msra.mxu0 %v1613_v5  ;;  %1523 = vmatpush3.bf16.msra.mxu1 %v1613_v5  ;;  %v1641_v27 = vld [vmem:[%s2008_s29 + $0xa0] ss:$8 sps:$4 sm:$0xff]   ;;  %v1646_v30 = vld [vmem:[%s2008_s29 + $0x30] ss:$8 sps:$4 sm:$0xff]   ;;  %v1648_v32 = vld [vmem:[%s2008_s29 + $0x44] ss:$8 sps:$4 sm:$0xff]  }
  0x66   : > { %1407 = vmatprep.subr.bf16.mxu0 %v1614_v6  ;;  %1516 = vmatprep.subr.bf16.mxu1 %v1614_v6  ;;  %v1647_v31 = vld [vmem:[%s2008_s29 + $0xb0] ss:$8 sps:$4 sm:$0xff]   ;;  %v1650_v33 = vld [vmem:[%s2008_s29 + $0xc4] ss:$8 sps:$4 sm:$0xff]   ;;  %v1652_v34 = vld [vmem:[%s2008_s29 + $0x40] ss:$8 sps:$4 sm:$0xff]  }
  0x67   : > { %v1653_v35 = vld [vmem:[%s2008_s29 + $0xc0] ss:$8 sps:$4 sm:$0xff]   ;;  %v1654_v36 = vld [vmem:[%s2008_s29 + $0x54] ss:$8 sps:$4 sm:$0xff]   ;;  %v1658_v38 = vld [vmem:[%s2008_s29 + $0x50] ss:$8 sps:$4 sm:$0xff]  }
  0x68   : > { %v1656_v37 = vld [vmem:[%s2008_s29 + $0xd4] ss:$8 sps:$4 sm:$0xff]   ;;  %v1659_v39 = vld [vmem:[%s2008_s29 + $0xd0] ss:$8 sps:$4 sm:$0xff]   ;;  %v1660_v40 = vld [vmem:[%s2008_s29 + $0x64] ss:$8 sps:$4 sm:$0xff]  }
  0x69   : > { %1408 = vmatpush3.bf16.msra.mxu0 %v1615_v7  ;;  %1524 = vmatpush3.bf16.msra.mxu1 %v1615_v7  ;;  %v1662_v41 = vld [vmem:[%s2008_s29 + $0xe4] ss:$8 sps:$4 sm:$0xff]   ;;  %v1664_v42 = vld [vmem:[%s2008_s29 + $0x60] ss:$8 sps:$4 sm:$0xff]   ;;  %v1666_v44 = vld [vmem:[%s2008_s29 + $0x74] ss:$8 sps:$4 sm:$0xff]  }
  0x6a   : > { %1409 = vmatprep.subr.bf16.mxu0 %v1616_v8  ;;  %1517 = vmatprep.subr.bf16.mxu1 %v1616_v8  ;;  %v1665_v43 = vld [vmem:[%s2008_s29 + $0xe0] ss:$8 sps:$4 sm:$0xff]   ;;  %v1668_v45 = vld [vmem:[%s2008_s29 + $0xf4] ss:$8 sps:$4 sm:$0xff]   ;;  %v1670_v46 = vld [vmem:[%s2008_s29 + $0x70] ss:$8 sps:$4 sm:$0xff]  }
  0x6b   : > { %v1671_v47 = vld [vmem:[%s2008_s29 + $0xf0] ss:$8 sps:$4 sm:$0xff]   ;;  %v2053_v51 = vld [vmem:[%s2201_s2] ss:$0 sm:$0xff]  ;;  %s1736_s29 = scalar_lea.vmem %s1735_s12, 4096 }
  0x6c   : > { %v2058_v57 = vld [vmem:[%s2202_s3] ss:$0 sm:$0xff]  ;;  %p1738_p11 = scmp.lt.s32.totalorder %s1736_s29, %s1730_s9 }
  0x6d   : > { %1410 = vmatpush3.bf16.msra.mxu0 %v1617_v9  ;;  %1525 = vmatpush3.bf16.msra.mxu1 %v1617_v9 }
  0x6e   : > { %1411 = vmatprep.subr.bf16.mxu0 %v1618_v10  ;;  %1518 = vmatprep.subr.bf16.mxu1 %v1618_v10  ;;  %p1739_p0 = por %p1738_p11, %p1737_p12 }
  0x70   : > { %p1740_p5 = pnand %p1739_p0, %p1733_p8 }
  0x71   : > { %1412 = vmatpush3.bf16.msra.mxu0 %v1619_v13  ;;  %1526 = vmatpush3.bf16.msra.mxu1 %v1619_v13 }
  0x72   : > { %1413 = vmatprep.subr.bf16.mxu0 %v1620_v14  ;;  %1519 = vmatprep.subr.bf16.mxu1 %v1620_v14 }
  0x75   : > { %1414 = vmatpush3.bf16.msra.mxu0 %v1621_v15  ;;  %1527 = vmatpush3.bf16.msra.mxu1 %v1621_v15 }
  0x76   : > { %1415 = vmatprep.subr.bf16.mxu0 %v1622_v16  ;;  %1520 = vmatprep.subr.bf16.mxu1 %v1622_v16 }
  0x79   : > { %1416 = vmatpush3.bf16.msra.mxu0 %v1623_v17  ;;  %1528 = vmatpush3.bf16.msra.mxu1 %v1623_v17 }
  0x7c   : > { %637 = vmatmul.mubr.bf16.vlgmr.msra.gmra.mrb[0].mxu0 %v1624_v18  ;;  %701 = vmatmul.mubr.bf16.vlgmr.msra.gmra.mrb[0].mxu1 %v1627_v19 }
  0x7d   : > { %644 = vmatprep.mubr.bf16.mxu0 %v1630_v20  ;;  %708 = vmatprep.mubr.bf16.mxu1 %v1632_v21 }
  0x84   : > { %645 = vmatmul.mubr.bf16.gmra.mrb[4].mxu0 %v1634_v22  ;;  %709 = vmatmul.mubr.bf16.gmra.mrb[4].mxu1 %v1635_v23 }
  0x85   : > { %652 = vmatprep.mubr.bf16.mxu0 %v1636_v24  ;;  %716 = vmatprep.mubr.bf16.mxu1 %v1638_v25 }
  0x8c   : > { %653 = vmatmul.mubr.bf16.gmra.mrb[8].mxu0 %v1640_v26  ;;  %717 = vmatmul.mubr.bf16.gmra.mrb[8].mxu1 %v1641_v27 }
  0x8d   : > { %660 = vmatprep.mubr.bf16.mxu0 %v1642_v28  ;;  %724 = vmatprep.mubr.bf16.mxu1 %v1644_v29 }
  0x94   : > { %661 = vmatmul.mubr.bf16.gmra.mrb[12].mxu0 %v1646_v30  ;;  %725 = vmatmul.mubr.bf16.gmra.mrb[12].mxu1 %v1647_v31 }
  0x95   : > { %668 = vmatprep.mubr.bf16.mxu0 %v1648_v32  ;;  %732 = vmatprep.mubr.bf16.mxu1 %v1650_v33 }
  0x9c   : > { %669 = vmatmul.mubr.bf16.gmra.mrb[16].mxu0 %v1652_v34  ;;  %733 = vmatmul.mubr.bf16.gmra.mrb[16].mxu1 %v1653_v35 }
  0x9d   : > { %676 = vmatprep.mubr.bf16.mxu0 %v1654_v36  ;;  %740 = vmatprep.mubr.bf16.mxu1 %v1656_v37 }
  0xa4   : > { %677 = vmatmul.mubr.bf16.gmra.mrb[20].mxu0 %v1658_v38  ;;  %741 = vmatmul.mubr.bf16.gmra.mrb[20].mxu1 %v1659_v39 }
  0xa5   : > { %684 = vmatprep.mubr.bf16.mxu0 %v1660_v40  ;;  %748 = vmatprep.mubr.bf16.mxu1 %v1662_v41 }
  0xac   : > { %685 = vmatmul.mubr.bf16.gmra.mrb[24].mxu0 %v1664_v42  ;;  %749 = vmatmul.mubr.bf16.gmra.mrb[24].mxu1 %v1665_v43 }
  0xad   : > { %692 = vmatprep.mubr.bf16.mxu0 %v1666_v44  ;;  %756 = vmatprep.mubr.bf16.mxu1 %v1668_v45 }
  0xb4   : > { %693 = vmatmul.mubr.bf16.gmra.mrb[28].mxu0 %v1670_v46  ;;  %757 = vmatmul.mubr.bf16.gmra.mrb[28].mxu1 %v1671_v47 }
 0x14f   : > { %v1417_v48 = vpop.f32.mrb[0].mxu0  ;;  %v1465_v49 = vpop.f32.mrb[0].mxu1 }
 0x150   : > { %v1418_v50 = vpop.f32.mrb[1].mxu0  ;;  %v1466_v52 = vpop.f32.mrb[1].mxu1 }
 0x151   : > { %v1419_v53 = vadd.f32 %v1418_v50, %v1417_v48  ;;  %v1467_v54 = vadd.f32 %v1466_v52, %v1465_v49  ;;  %v1420_v55 = vpop.f32.mrb[2].mxu0  ;;  %v1468_v56 = vpop.f32.mrb[2].mxu1 }
 0x152   : > { %v1421_v58 = vpop.f32.mrb[3].mxu0  ;;  %v1469_v59 = vpop.f32.mrb[3].mxu1 }
 0x153   : > { %v772_v60 = vmul.f32 %v1419_v53, %v2053_v51  ;;  %v788_v61 = vmul.f32 %v1467_v54, %v2053_v51  ;;  %v1422_v62 = vadd.f32 %v1421_v58, %v1420_v55  ;;  %v1470_v63 = vadd.f32 %v1469_v59, %v1468_v56 }
 0x155   : > { %v811_v0 = vadd.f32 %v2058_v57, %v772_v60  ;;  %v827_v1 = vadd.f32 %v2058_v57, %v788_v61  ;;  %v773_v2 = vmul.f32 %v1422_v62, %v2053_v51  ;;  %v789_v3 = vmul.f32 %v1470_v63, %v2053_v51 }
 0x157   : > { %v812_v4 = vadd.f32 %v2058_v57, %v773_v2  ;;  %v828_v5 = vadd.f32 %v2058_v57, %v789_v3  ;;  %v1423_v6 = vpop.f32.mrb[4].mxu0  ;;  %v1471_v7 = vpop.f32.mrb[4].mxu1  ;;  %v843_v8 = vmax.f32 %v811_v0, 0.0  ;;  %v859_v9 = vmax.f32 %v827_v1, 0.0 }
 0x158   : > { %v1424_v10 = vpop.f32.mrb[5].mxu0  ;;  %v1472_v11 = vpop.f32.mrb[5].mxu1 }
 0x159   : > { %v844_v12 = vmax.f32 %v812_v4, 0.0  ;;  %v860_v13 = vmax.f32 %v828_v5, 0.0  ;;  %v1425_v14 = vadd.f32 %v1424_v10, %v1423_v6  ;;  %v1473_v15 = vadd.f32 %v1472_v11, %v1471_v7  ;;  %v1426_v16 = vpop.f32.mrb[6].mxu0  ;;  %v1474_v17 = vpop.f32.mrb[6].mxu1 }
 0x15a   : > { %v1427_v18 = vpop.f32.mrb[7].mxu0  ;;  %v1475_v19 = vpop.f32.mrb[7].mxu1 }
 0x15b   : > { %v1309_v20 = vpack.c.bf16 %v844_v12, %v843_v8  ;;  %v1349_v21 = vpack.c.bf16 %v860_v13, %v859_v9  ;;  %v774_v22 = vmul.f32 %v1425_v14, %v2053_v51  ;;  %v790_v23 = vmul.f32 %v1473_v15, %v2053_v51 }
 0x15c   : > { %v1428_v24 = vadd.f32 %v1427_v18, %v1426_v16  ;;  %v1476_v25 = vadd.f32 %v1475_v19, %v1474_v17 }
 0x15d   : > { %1310 = vst [vmem:[%s2071_s22] sm:$0xff] %v1309_v20   ;;  %1393 = vst [vmem:[%s2071_s22 + $0x40] sm:$0xff] %v1349_v21   ;;  %v813_v26 = vadd.f32 %v2058_v57, %v774_v22  ;;  %v829_v27 = vadd.f32 %v2058_v57, %v790_v23 }
 0x15e   : > { %v775_v28 = vmul.f32 %v1428_v24, %v2053_v51  ;;  %v791_v29 = vmul.f32 %v1476_v25, %v2053_v51 }
 0x15f   : > { %v1429_v30 = vpop.f32.mrb[8].mxu0  ;;  %v1477_v31 = vpop.f32.mrb[8].mxu1  ;;  %v845_v40 = vmax.f32 %v813_v26, 0.0  ;;  %v861_v41 = vmax.f32 %v829_v27, 0.0 }
 0x160   : > { %v814_v32 = vadd.f32 %v2058_v57, %v775_v28  ;;  %v830_v33 = vadd.f32 %v2058_v57, %v791_v29  ;;  %v1430_v34 = vpop.f32.mrb[9].mxu0  ;;  %v1478_v35 = vpop.f32.mrb[9].mxu1 }
 0x161   : > { %v1431_v36 = vadd.f32 %v1430_v34, %v1429_v30  ;;  %v1479_v37 = vadd.f32 %v1478_v35, %v1477_v31  ;;  %v1432_v38 = vpop.f32.mrb[10].mxu0  ;;  %v1480_v39 = vpop.f32.mrb[10].mxu1 }
 0x162   : > { %v846_v42 = vmax.f32 %v814_v32, 0.0  ;;  %v862_v43 = vmax.f32 %v830_v33, 0.0  ;;  %v1433_v44 = vpop.f32.mrb[11].mxu0  ;;  %v1481_v45 = vpop.f32.mrb[11].mxu1 }
 0x163   : > { %v776_v46 = vmul.f32 %v1431_v36, %v2053_v51  ;;  %v792_v47 = vmul.f32 %v1479_v37, %v2053_v51  ;;  %v1434_v48 = vadd.f32 %v1433_v44, %v1432_v38  ;;  %v1482_v49 = vadd.f32 %v1481_v45, %v1480_v39 }
 0x164   : > { %v1314_v50 = vpack.c.bf16 %v846_v42, %v845_v40  ;;  %v1354_v52 = vpack.c.bf16 %v862_v43, %v861_v41 }
 0x165   : > { %v815_v53 = vadd.f32 %v2058_v57, %v776_v46  ;;  %v831_v54 = vadd.f32 %v2058_v57, %v792_v47  ;;  %v777_v55 = vmul.f32 %v1434_v48, %v2053_v51  ;;  %v793_v56 = vmul.f32 %v1482_v49, %v2053_v51 }
 0x166   : > { %1386 = vst [vmem:[%s2071_s22 + $0x8] sm:$0xff] %v1314_v50   ;;  %1394 = vst [vmem:[%s2071_s22 + $0x48] sm:$0xff] %v1354_v52  }
 0x167   : > { %v816_v58 = vadd.f32 %v2058_v57, %v777_v55  ;;  %v832_v59 = vadd.f32 %v2058_v57, %v793_v56  ;;  %v1435_v60 = vpop.f32.mrb[12].mxu0  ;;  %v1483_v61 = vpop.f32.mrb[12].mxu1  ;;  %v847_v62 = vmax.f32 %v815_v53, 0.0  ;;  %v863_v63 = vmax.f32 %v831_v54, 0.0 }
 0x168   : > { %v1436_v0 = vpop.f32.mrb[13].mxu0  ;;  %v1484_v1 = vpop.f32.mrb[13].mxu1 }
 0x169   : > { %v848_v2 = vmax.f32 %v816_v58, 0.0  ;;  %v864_v3 = vmax.f32 %v832_v59, 0.0  ;;  %v1437_v4 = vadd.f32 %v1436_v0, %v1435_v60  ;;  %v1485_v5 = vadd.f32 %v1484_v1, %v1483_v61  ;;  %v1438_v6 = vpop.f32.mrb[14].mxu0  ;;  %v1486_v7 = vpop.f32.mrb[14].mxu1 }
 0x16a   : > { %v1439_v8 = vpop.f32.mrb[15].mxu0  ;;  %v1487_v9 = vpop.f32.mrb[15].mxu1 }
 0x16b   : > { %v1319_v10 = vpack.c.bf16 %v848_v2, %v847_v62  ;;  %v1359_v11 = vpack.c.bf16 %v864_v3, %v863_v63  ;;  %v778_v12 = vmul.f32 %v1437_v4, %v2053_v51  ;;  %v794_v13 = vmul.f32 %v1485_v5, %v2053_v51 }
 0x16c   : > { %v1440_v14 = vadd.f32 %v1439_v8, %v1438_v6  ;;  %v1488_v15 = vadd.f32 %v1487_v9, %v1486_v7 }
 0x16d   : > { %1387 = vst [vmem:[%s2071_s22 + $0x10] sm:$0xff] %v1319_v10   ;;  %1395 = vst [vmem:[%s2071_s22 + $0x50] sm:$0xff] %v1359_v11   ;;  %v817_v16 = vadd.f32 %v2058_v57, %v778_v12  ;;  %v833_v17 = vadd.f32 %v2058_v57, %v794_v13 }
 0x16e   : > { %v779_v18 = vmul.f32 %v1440_v14, %v2053_v51  ;;  %v795_v19 = vmul.f32 %v1488_v15, %v2053_v51 }
 0x16f   : > { %v1441_v20 = vpop.f32.mrb[16].mxu0  ;;  %v1489_v21 = vpop.f32.mrb[16].mxu1  ;;  %v849_v30 = vmax.f32 %v817_v16, 0.0  ;;  %v865_v31 = vmax.f32 %v833_v17, 0.0 }
 0x170   : > { %v818_v22 = vadd.f32 %v2058_v57, %v779_v18  ;;  %v834_v23 = vadd.f32 %v2058_v57, %v795_v19  ;;  %v1442_v24 = vpop.f32.mrb[17].mxu0  ;;  %v1490_v25 = vpop.f32.mrb[17].mxu1 }
 0x171   : > { %v1443_v26 = vadd.f32 %v1442_v24, %v1441_v20  ;;  %v1491_v27 = vadd.f32 %v1490_v25, %v1489_v21  ;;  %v1444_v28 = vpop.f32.mrb[18].mxu0  ;;  %v1492_v29 = vpop.f32.mrb[18].mxu1 }
 0x172   : > { %v850_v32 = vmax.f32 %v818_v22, 0.0  ;;  %v866_v33 = vmax.f32 %v834_v23, 0.0  ;;  %v1445_v34 = vpop.f32.mrb[19].mxu0  ;;  %v1493_v35 = vpop.f32.mrb[19].mxu1 }
 0x173   : > { %v780_v36 = vmul.f32 %v1443_v26, %v2053_v51  ;;  %v796_v37 = vmul.f32 %v1491_v27, %v2053_v51  ;;  %v1446_v38 = vadd.f32 %v1445_v34, %v1444_v28  ;;  %v1494_v39 = vadd.f32 %v1493_v35, %v1492_v29 }
 0x174   : > { %v1324_v40 = vpack.c.bf16 %v850_v32, %v849_v30  ;;  %v1364_v41 = vpack.c.bf16 %v866_v33, %v865_v31 }
 0x175   : > { %v819_v42 = vadd.f32 %v2058_v57, %v780_v36  ;;  %v835_v43 = vadd.f32 %v2058_v57, %v796_v37  ;;  %v781_v44 = vmul.f32 %v1446_v38, %v2053_v51  ;;  %v797_v45 = vmul.f32 %v1494_v39, %v2053_v51 }
 0x176   : > { %1388 = vst [vmem:[%s2071_s22 + $0x18] sm:$0xff] %v1324_v40   ;;  %1396 = vst [vmem:[%s2071_s22 + $0x58] sm:$0xff] %v1364_v41  }
 0x177   : > { %v820_v46 = vadd.f32 %v2058_v57, %v781_v44  ;;  %v836_v47 = vadd.f32 %v2058_v57, %v797_v45  ;;  %v1447_v48 = vpop.f32.mrb[20].mxu0  ;;  %v1495_v49 = vpop.f32.mrb[20].mxu1  ;;  %v851_v50 = vmax.f32 %v819_v42, 0.0  ;;  %v867_v52 = vmax.f32 %v835_v43, 0.0 }
 0x178   : > { %v1448_v53 = vpop.f32.mrb[21].mxu0  ;;  %v1496_v54 = vpop.f32.mrb[21].mxu1 }
 0x179   : > { %v852_v55 = vmax.f32 %v820_v46, 0.0  ;;  %v868_v56 = vmax.f32 %v836_v47, 0.0  ;;  %v1449_v58 = vadd.f32 %v1448_v53, %v1447_v48  ;;  %v1497_v59 = vadd.f32 %v1496_v54, %v1495_v49  ;;  %v1450_v60 = vpop.f32.mrb[22].mxu0  ;;  %v1498_v61 = vpop.f32.mrb[22].mxu1 }
 0x17a   : > { %v1451_v62 = vpop.f32.mrb[23].mxu0  ;;  %v1499_v63 = vpop.f32.mrb[23].mxu1 }
 0x17b   : > { %v1329_v0 = vpack.c.bf16 %v852_v55, %v851_v50  ;;  %v1369_v1 = vpack.c.bf16 %v868_v56, %v867_v52  ;;  %v782_v2 = vmul.f32 %v1449_v58, %v2053_v51  ;;  %v798_v3 = vmul.f32 %v1497_v59, %v2053_v51 }
 0x17c   : > { %v1452_v4 = vadd.f32 %v1451_v62, %v1450_v60  ;;  %v1500_v5 = vadd.f32 %v1499_v63, %v1498_v61 }
 0x17d   : > { %1389 = vst [vmem:[%s2071_s22 + $0x20] sm:$0xff] %v1329_v0   ;;  %1397 = vst [vmem:[%s2071_s22 + $0x60] sm:$0xff] %v1369_v1   ;;  %v821_v6 = vadd.f32 %v2058_v57, %v782_v2  ;;  %v837_v7 = vadd.f32 %v2058_v57, %v798_v3 }
 0x17e   : > { %v783_v8 = vmul.f32 %v1452_v4, %v2053_v51  ;;  %v799_v9 = vmul.f32 %v1500_v5, %v2053_v51 }
 0x17f   : > { %v1453_v10 = vpop.f32.mrb[24].mxu0  ;;  %v1501_v11 = vpop.f32.mrb[24].mxu1  ;;  %v853_v20 = vmax.f32 %v821_v6, 0.0  ;;  %v869_v21 = vmax.f32 %v837_v7, 0.0 }
 0x180   : > { %v822_v12 = vadd.f32 %v2058_v57, %v783_v8  ;;  %v838_v13 = vadd.f32 %v2058_v57, %v799_v9  ;;  %v1454_v14 = vpop.f32.mrb[25].mxu0  ;;  %v1502_v15 = vpop.f32.mrb[25].mxu1 }
 0x181   : > { %v1455_v16 = vadd.f32 %v1454_v14, %v1453_v10  ;;  %v1503_v17 = vadd.f32 %v1502_v15, %v1501_v11  ;;  %v1456_v18 = vpop.f32.mrb[26].mxu0  ;;  %v1504_v19 = vpop.f32.mrb[26].mxu1 }
 0x182   : > { %v854_v22 = vmax.f32 %v822_v12, 0.0  ;;  %v870_v23 = vmax.f32 %v838_v13, 0.0  ;;  %v1457_v24 = vpop.f32.mrb[27].mxu0  ;;  %v1505_v25 = vpop.f32.mrb[27].mxu1 }
 0x183   : > { %v784_v26 = vmul.f32 %v1455_v16, %v2053_v51  ;;  %v800_v27 = vmul.f32 %v1503_v17, %v2053_v51  ;;  %v1458_v28 = vadd.f32 %v1457_v24, %v1456_v18  ;;  %v1506_v29 = vadd.f32 %v1505_v25, %v1504_v19 }
 0x184   : > { %v1334_v30 = vpack.c.bf16 %v854_v22, %v853_v20  ;;  %v1374_v31 = vpack.c.bf16 %v870_v23, %v869_v21 }
 0x185   : > { %v823_v32 = vadd.f32 %v2058_v57, %v784_v26  ;;  %v839_v33 = vadd.f32 %v2058_v57, %v800_v27  ;;  %v785_v34 = vmul.f32 %v1458_v28, %v2053_v51  ;;  %v801_v35 = vmul.f32 %v1506_v29, %v2053_v51 }
 0x186   : > { %1390 = vst [vmem:[%s2071_s22 + $0x28] sm:$0xff] %v1334_v30   ;;  %1398 = vst [vmem:[%s2071_s22 + $0x68] sm:$0xff] %v1374_v31  }
 0x187   : > { %v824_v36 = vadd.f32 %v2058_v57, %v785_v34  ;;  %v840_v37 = vadd.f32 %v2058_v57, %v801_v35  ;;  %v1459_v38 = vpop.f32.mrb[28].mxu0  ;;  %v1507_v39 = vpop.f32.mrb[28].mxu1  ;;  %v855_v40 = vmax.f32 %v823_v32, 0.0  ;;  %v871_v41 = vmax.f32 %v839_v33, 0.0 }
 0x188   : > { %v1460_v42 = vpop.f32.mrb[29].mxu0  ;;  %v1508_v43 = vpop.f32.mrb[29].mxu1 }
 0x189   : > { %v856_v44 = vmax.f32 %v824_v36, 0.0  ;;  %v872_v45 = vmax.f32 %v840_v37, 0.0  ;;  %v1461_v46 = vadd.f32 %v1460_v42, %v1459_v38  ;;  %v1509_v47 = vadd.f32 %v1508_v43, %v1507_v39  ;;  %v1462_v48 = vpop.f32.mrb[30].mxu0  ;;  %v1510_v49 = vpop.f32.mrb[30].mxu1 }
 0x18a   : > { %v1463_v50 = vpop.f32.mrb[31].mxu0  ;;  %v1511_v52 = vpop.f32.mrb[31].mxu1 }
 0x18b   : > { %v1339_v53 = vpack.c.bf16 %v856_v44, %v855_v40  ;;  %v1379_v54 = vpack.c.bf16 %v872_v45, %v871_v41  ;;  %v786_v55 = vmul.f32 %v1461_v46, %v2053_v51  ;;  %v802_v56 = vmul.f32 %v1509_v47, %v2053_v51 }
 0x18c   : > { %v1464_v58 = vadd.f32 %v1463_v50, %v1462_v48  ;;  %v1512_v59 = vadd.f32 %v1511_v52, %v1510_v49 }
 0x18d   : > { %1391 = vst [vmem:[%s2071_s22 + $0x30] sm:$0xff] %v1339_v53   ;;  %1399 = vst [vmem:[%s2071_s22 + $0x70] sm:$0xff] %v1379_v54   ;;  %v825_v60 = vadd.f32 %v2058_v57, %v786_v55  ;;  %v841_v61 = vadd.f32 %v2058_v57, %v802_v56 }
 0x18e   : > { %v787_v62 = vmul.f32 %v1464_v58, %v2053_v51  ;;  %v803_v63 = vmul.f32 %v1512_v59, %v2053_v51 }
 0x18f   : > { %v857_v2 = vmax.f32 %v825_v60, 0.0  ;;  %v873_v3 = vmax.f32 %v841_v61, 0.0 }
 0x190   : > { %v826_v0 = vadd.f32 %v2058_v57, %v787_v62  ;;  %v842_v1 = vadd.f32 %v2058_v57, %v803_v63 }
 0x192   : > { %v858_v4 = vmax.f32 %v826_v0, 0.0  ;;  %v874_v5 = vmax.f32 %v842_v1, 0.0 }
 0x194   : > { %v1344_v51 = vpack.c.bf16 %v858_v4, %v857_v2  ;;  %v1384_v6 = vpack.c.bf16 %v874_v5, %v873_v3 }
 0x196   : > { %1392 = vst [vmem:[%s2071_s22 + $0x38] sm:$0xff] %v1344_v51   ;;  %1400 = vst [vmem:[%s2071_s22 + $0x78] sm:$0xff] %v1384_v6  }
 0x197   : > { %1743 = shalt.err (!%p1740_p5)
}
 0x198   : > { %s1744_s23 = scalar_lea.hbm %s2146_s6, 2048  ;;  %s1748_s14 = scalar_lea.hbm %s2203_s4, 4096 }
 0x199   : > { %p1745_p9 = scmp.ne.s32.totalorder %s2146_s6, %s1744_s23  ;;  %p1749_p3 = scmp.lt.u32.totalorder %s2146_s6, %s2203_s4 }
 0x19a   : > { %p1750_p7 = scmp.lt.u32.totalorder %s1748_s14, %s1744_s23  ;;  %p1752_p4 = scmp.lt.u32.totalorder %s1744_s23, %s2146_s6 }
 0x19b   : > { %p1746_p1 = pnand %p1745_p9, %p1948_p10 }
 0x19c   : > { %p1751_p13 = por %p1750_p7, %p1749_p3 }
 0x19d   : > { %p1747_p2 = pneg %p1746_p1 }
 0x19e   : > { %p1753_p6 = por %p1752_p4, %p1751_p13 }
 0x1a0   : > { %p1754_p8 = pnand %p1753_p6, %p1747_p2 }
 0x1a2   : > { %1757 = shalt.err (!%p1754_p8)
}
 0x1a3   : > { %s1825_s28 = smov 64   ;;  %s1826_s24 = smov 4  }
 0x1a4   : > { %1535 = dma.vmem_to_hbm [thread:$0]  (%p1948_p10), %s2148_s13, 2048, %s2146_s6, %s1036_s18, %s1825_s28, %s1825_s28, %s1826_s24  }
 0x1a5 PF: > { %s1065_s30 = sand.u32 1, %s1796_s15   ;;  %p2221_p12 = scmp.ne.s32.totalorder %s2211_s26, 0 }
 0x1a6   : > { %p2222_p11 = scmp.ge.s32.totalorder %s1816_s20, 2  ;;  %s1066_s9 = scalar_lea.sflag [#allocation4], %s1065_s30 }
 0x1a8   : > { %p1546_p0 = pnand %p2222_p11, %p2221_p12 }
 0x1aa   : > { %1791 = dma.done.wait (!%p1546_p0), %s1066_s9, 2048  }
 0x1ab   : > { %1793 = vsyncadd (!%p1546_p0), %s1066_s9, 4294965248  ;;  %s21_s20 = sadd.s32 1, %s1816_s20   ;;  %s2223_s15 = smov %s1800_s16 }
 0x1ac   : > { %p18_p5 = scmp.ge.s32.totalorder %s21_s20, 4   ;;  %s2224_s16 = smov %s1804_s17 }
 0x1ad   : > { %s2225_s17 = smov %s1957_s10  ;;  %s2226_s18 = smov %s1812_s19 }
 0x1ae   : > { %s2227_s19 = smov %s2229_s5  ;;  %20 = sbr.rel (!%p18_p5) target bundleno = 7 (0x7), region = 92 }
 0x1b5   :  { %1071 = vsyncpa [#allocation3], 1 }
 0x1b6   :  { %1073 = vsyncpa [#allocation3 + $0x1], 1 }
 0x1b7   :  { %1074 = vsyncpa [#allocation6], 1 }
 0x1b8   :  { %1075 = vsyncpa [#allocation4], 1 }
 0x1b9   :  { %1077 = vsyncpa [#allocation4 + $0x1], 1 }

</bundles_post_ra>
